<compile_context>
chip_gen: v7x
topology: tpu7x:2x2x1
jax: 0.10.0
libtpu: 0.0.40
codegen_flags: <defaults>
</compile_context>

<pallas_src>
import functools

import jax
import jax.numpy as jnp
import numpy as np
from jax.experimental import pallas as pl
from jax.experimental.pallas import tpu as pltpu


def _round_up(x, m):
    return ((x + m - 1) // m) * m


def _segment_sum_kernel(gene_ix_ref, emb_ref, out_ref, *maybe_acc,
                        n_sites, tile_sites, tile_genes, mask_tail):
    """One (gene tile, emb-dim tile, site tile) grid step of the segment-sum."""
    acc_ref = maybe_acc[0] if maybe_acc else out_ref
    s = pl.program_id(2)                       # site-tile index (reduction axis)
    last_s = pl.num_programs(2) - 1

    @pl.when(s == 0)
    def _():
        acc_ref[...] = jnp.zeros_like(acc_ref)

    emb = emb_ref[...]                         # (TS, TD), native dtype
    gene_ix = gene_ix_ref[...]                 # (1, TS) int32, padded slots = -1

    # one_hot[r, i] = (gene_ix[i] == gene_base + r).  {0,1} is exact in any
    # float dtype, so all compare work stays int32 (v5e has no bf16 VALU) and
    # only the final cast uses the embedding dtype (bf16 hits the fast MXU
    # path).  NOTE: the iota is rebuilt per step; negligible for small
    # tile_genes and bounded by the gene tiling below.
    gene_base = pl.program_id(0) * tile_genes
    rel_ix = gene_ix - gene_base               # (1, TS); out-of-tile / -1 never match
    gene_iota = jax.lax.broadcasted_iota(
        jnp.int32, (acc_ref.shape[0], emb.shape[0]), 0)
    one_hot = (gene_iota == rel_ix).astype(emb.dtype)          # (TG, TS)

    def _accumulate(e):
        acc_ref[...] += jnp.dot(one_hot, e,
                                preferred_element_type=jnp.float32
                                ).astype(acc_ref.dtype)

    if mask_tail:
        # Only the LAST site tile is ragged: gate the row mask so full tiles
        # never pay for the iota/compare/select (perf feedback for v7x).
        tail = n_sites % tile_sites            # static, > 0 when mask_tail

        @pl.when(s != last_s)
        def _():
            _accumulate(emb)

        @pl.when(s == last_s)
        def _():
            # Zero the out-of-bounds rows: the one-hot columns are already
            # zero for padded slots, but 0 * NaN = NaN, so undefined memory in
            # the partial block must not reach the MXU.
            row = jax.lax.broadcasted_iota(jnp.int32, emb.shape, 0)
            _accumulate(jnp.where(row < tail, emb, jnp.zeros_like(emb)))
    else:
        _accumulate(emb)

    if maybe_acc:
        @pl.when(s == last_s)
        def _():
            out_ref[...] = acc_ref[...].astype(out_ref.dtype)


@functools.partial(jax.jit, static_argnames=("n_genes", "tile_sites",
                                             "tile_dim", "tile_genes"))
def site_embedding_gene_pooler(embedding, local_gene_ix, n_genes,
                               tile_sites=1024, tile_dim=None, tile_genes=None):
    """Equivalent of SiteEmbeddingGenePooler(reduce='sum').forward(...).

    embedding:      (n_sites, emb_dim) float array
    local_gene_ix:  (n_sites,) integer gene index per site
    n_genes:        number of output segments (dim_size)
    tile_sites:     site-tile size (rounded to a multiple of 128), reduction axis
    tile_dim:       optional emb_dim tile (parallel axis); auto-chosen if None
    tile_genes:     optional gene tile (parallel axis); auto-chosen if None
    """
    n_sites, emb_dim = embedding.shape
    out_dtype = embedding.dtype

    if n_sites == 0:
        # segment_sum over nothing is all zeros; also avoids feeding a fully
        # out-of-bounds (undefined) tile to the MXU.
        return jnp.zeros((n_genes, emb_dim), dtype=out_dtype)

    dtype_bytes = embedding.dtype.itemsize

    # --- site (reduction) axis ------------------------------------------------
    tile_sites = max(128, _round_up(min(tile_sites, _round_up(n_sites, 128)), 128))
    n_site_tiles = pl.cdiv(n_sites, tile_sites)
    n_sites_pad = n_site_tiles * tile_sites
    # Pad ONLY the tiny index array (never the embedding); padded slots get -1,
    # which never matches a gene (same drop-out-of-range semantics as
    # segment_sum).  Lane-dense shape (1, n_sites_pad).
    ix_p = jnp.pad(local_gene_ix.astype(jnp.int32),
                   ((0, n_sites_pad - n_sites),),
                   constant_values=-1).reshape(1, n_sites_pad)

    # --- emb_dim tiling (megacore "parallel" axis) ------------------------------
    if tile_dim is None:
        if emb_dim % 128 != 0:
            # 128-aligned cdiv tiling (ragged last dim tile) instead of the old
            # tile_dim = emb_dim fallback that could blow VMEM.
            tile_dim = emb_dim if emb_dim <= 512 else 512
        elif emb_dim >= 256:
            # >= 2 dim tiles so the leading "parallel" axes keep both v7x
            # TensorCores busy.
            tile_dim = min(512, (emb_dim // 2 // 128) * 128)
        else:
            tile_dim = emb_dim
    tile_dim = min(tile_dim, emb_dim)
    if tile_dim < emb_dim and tile_dim % 128 != 0:
        tile_dim = min(emb_dim, _round_up(tile_dim, 128))
    n_dim_tiles = pl.cdiv(emb_dim, tile_dim)
    # TODO(synk): for emb_dim < 256 only one v7x TensorCore is used; splitting
    # the site axis across cores needs per-core partial sums + a combine step.
    # TODO(synk): for emb_dim < 128 the output stores are lane-sparse (masked
    # vst); batching several pooling problems along the feature axis would
    # restore lane-dense stores, but that changes the module interface.

    # --- gene tiling (bounds resident accumulator / one-hot for big n_genes) ---
    if tile_genes is None:
        tile_genes = n_genes
        if n_genes * tile_dim * 4 > (4 << 20):        # keep acc block <= ~4 MiB
            tile_genes = max(8, ((4 << 20) // (tile_dim * 4)) // 8 * 8)
    tile_genes = min(tile_genes, n_genes)
    if tile_genes < n_genes:
        tile_genes = max(8, (tile_genes // 8) * 8)
    n_gene_tiles = pl.cdiv(n_genes, tile_genes)
    # TODO(synk): for very large n_genes with sorted indices, scalar-prefetched
    # per-site-tile gene ranges would make the one-hot cost independent of the
    # vocabulary size; gene tiling only bounds VMEM, not the MXU/VPU work.

    mask_tail = (n_sites % tile_sites) != 0
    use_scratch = embedding.dtype != jnp.float32   # f32 accumulates in out_ref

    kernel = functools.partial(_segment_sum_kernel, n_sites=n_sites,
                               tile_sites=tile_sites, tile_genes=tile_genes,
                               mask_tail=mask_tail)

    scratch_shapes = ([pltpu.VMEM((tile_genes, tile_dim), jnp.float32)]
                      if use_scratch else [])

    # Embedding stream: deeper input pipelining keeps the DMA engine queued on
    # v7x when the per-step compute is tiny.
    emb_map = lambda g, d, s: (s, d)
    if n_site_tiles >= 3:
        emb_spec = pl.BlockSpec((tile_sites, tile_dim), emb_map,
                                pipeline_mode=pl.Buffered(3))
        emb_bufs = 3
    else:
        emb_spec = pl.BlockSpec((tile_sites, tile_dim), emb_map)
        emb_bufs = 2

    # --- VMEM budget (v5e scoped default is only 16 MiB) ------------------------
    vmem_need = (emb_bufs * tile_sites * tile_dim * dtype_bytes     # emb buffers
                 + 2 * tile_sites * 4                               # index buffers
                 + 2 * tile_genes * tile_dim * max(dtype_bytes, 4)  # out block
                 + (tile_genes * tile_dim * 4 if use_scratch else 0)
                 + tile_genes * tile_sites * 4)                     # one-hot temp
    vmem_limit = int(min(max(vmem_need * 5 // 4 + (2 << 20), 32 << 20), 56 << 20))

    cost = pl.CostEstimate(
        flops=2 * n_genes * n_sites * emb_dim,
        transcendentals=0,
        bytes_accessed=(n_sites * emb_dim * dtype_bytes      # embedding read
                        + n_sites_pad * 4                    # indices read
                        + n_genes * emb_dim * dtype_bytes))  # output write

    out = pl.pallas_call(
        kernel,
        out_shape=jax.ShapeDtypeStruct((n_genes, emb_dim), out_dtype),
        grid_spec=pltpu.PrefetchScalarGridSpec(
            num_scalar_prefetch=0,
            grid=(n_gene_tiles, n_dim_tiles, n_site_tiles),   # reduction last
            in_specs=[
                pl.BlockSpec((1, tile_sites), lambda g, d, s: (0, s)),
                emb_spec,
            ],
            out_specs=pl.BlockSpec((tile_genes, tile_dim),
                                   lambda g, d, s: (g, d)),
            scratch_shapes=scratch_shapes,
        ),
        compiler_params=pltpu.CompilerParams(
            dimension_semantics=("parallel", "parallel", "arbitrary"),
            vmem_limit_bytes=vmem_limit),
        cost_estimate=cost,
    )(ix_p, embedding)
    return out


if __name__ == "__main__":
    key = jax.random.PRNGKey(0)
    k1, k2, k3, k4, k5, k6 = jax.random.split(key, 6)

    # Case 1: tiny problem, single partial site tile, lane-sparse emb_dim.
    n_sites, emb_dim, n_genes = 200, 32, 12
    embedding = jax.random.normal(k1, (n_sites, emb_dim), dtype=jnp.float32)
    # segment_sum_coo expects sorted indices; sort to match the reference setup
    # (the kernel itself does not require sortedness).
    local_gene_ix = jnp.sort(
        jax.random.randint(k2, (n_sites,), 0, n_genes, dtype=jnp.int32))
    out = jax.block_until_ready(
        site_embedding_gene_pooler(embedding, local_gene_ix, n_genes))
    ref = jax.ops.segment_sum(embedding, local_gene_ix, num_segments=n_genes)
    np.testing.assert_allclose(np.asarray(out), np.asarray(ref),
                               rtol=1e-5, atol=1e-5)

    # Case 2: multiple site tiles + ragged tail, lane-full embedding dim.
    n_sites, emb_dim, n_genes = 1337, 128, 24
    embedding = jax.random.normal(k3, (n_sites, emb_dim), dtype=jnp.float32)
    local_gene_ix = jnp.sort(
        jax.random.randint(k4, (n_sites,), 0, n_genes, dtype=jnp.int32))
    out = jax.block_until_ready(
        site_embedding_gene_pooler(embedding, local_gene_ix, n_genes))
    ref = jax.ops.segment_sum(embedding, local_gene_ix, num_segments=n_genes)
    np.testing.assert_allclose(np.asarray(out), np.asarray(ref),
                               rtol=1e-5, atol=1e-5)

    # Case 3: bf16 (f32-scratch path), >=3 site tiles (Buffered(3) path),
    # emb_dim tiling (2 dim tiles) and explicit gene tiling with a ragged
    # last gene tile.
    n_sites, emb_dim, n_genes = 3000, 256, 40
    emb_f32 = jax.random.normal(k5, (n_sites, emb_dim), dtype=jnp.float32)
    embedding = emb_f32.astype(jnp.bfloat16)
    local_gene_ix = jnp.sort(
        jax.random.randint(k6, (n_sites,), 0, n_genes, dtype=jnp.int32))
    out = jax.block_until_ready(
        site_embedding_gene_pooler(embedding, local_gene_ix, n_genes,
                                   tile_genes=16))
    # Kernel accumulates bf16 inputs in f32 and casts once at the end (more
    # accurate than a pure-bf16 torch_scatter reference), so compare against
    # an f32 reference with bf16 tolerances.
    ref = jax.ops.segment_sum(embedding.astype(jnp.float32), local_gene_ix,
                              num_segments=n_genes)
    np.testing.assert_allclose(np.asarray(out, dtype=np.float32),
                               np.asarray(ref), rtol=2e-2, atol=2e-2)

    print("KERNEL_OK")
</pallas_src>

<mosaic_0001>
module attributes {stable_mosaic.version = 11 : i64} {
  func.func @_segment_sum_kernel(%arg0: i32, %arg1: i32, %arg2: i32, %arg3: memref<1x256xi32, #tpu.memory_space<vmem>>, %arg4: memref<256x32xf32, #tpu.memory_space<vmem>>, %arg5: memref<12x32xf32, #tpu.memory_space<vmem>>) attributes {dimension_semantics = [#tpu.dimension_semantics<parallel>, #tpu.dimension_semantics<parallel>, #tpu.dimension_semantics<arbitrary>], iteration_bounds = array<i64: 1, 1, 1>, scalar_prefetch = 0 : i64, scratch_operands = 0 : i64, tpu.core_type = #tpu.core_type<tc>, window_params = [{transform_indices = @transform_0, window_bounds = array<i64: 1, 256>}, {transform_indices = @transform_1, window_bounds = array<i64: 256, 32>}, {transform_indices = @transform_2, window_bounds = array<i64: 12, 32>}]} {
    %c0_i32 = arith.constant 0 : i32
    %0 = arith.cmpi eq, %arg2, %c0_i32 : i32
    %1 = arith.extui %0 : i1 to i32
    %c0_i32_0 = arith.constant 0 : i32
    %2 = arith.cmpi ne, %1, %c0_i32_0 : i32
    scf.if %2 {
      %cst = arith.constant 0.000000e+00 : f32
      %19 = vector.broadcast %cst : f32 to vector<12x32xf32>
      %c0_8 = arith.constant 0 : index
      %c0_9 = arith.constant 0 : index
      %20 = vector.load %arg5[%c0_8, %c0_9] : memref<12x32xf32, #tpu.memory_space<vmem>>, vector<12x32xf32>
      tpu.vector_store %arg5[%c0_8, %c0_9], %19 {strides = array<i32>} : memref<12x32xf32, #tpu.memory_space<vmem>>, vector<12x32xf32>,
    } else {
    }
    %c0 = arith.constant 0 : index
    %c0_1 = arith.constant 0 : index
    %3 = vector.load %arg4[%c0, %c0_1] : memref<256x32xf32, #tpu.memory_space<vmem>>, vector<256x32xf32>
    %c0_2 = arith.constant 0 : index
    %c0_3 = arith.constant 0 : index
    %4 = vector.load %arg3[%c0_2, %c0_3] : memref<1x256xi32, #tpu.memory_space<vmem>>, vector<1x256xi32>
    %c12_i32 = arith.constant 12 : i32
    %5 = arith.muli %arg0, %c12_i32 : i32
    %6 = vector.broadcast %5 : i32 to vector<1x256xi32>
    %7 = arith.subi %4, %6 : vector<1x256xi32>
    %8 = tpu.iota {dimensions = array<i32: 0>} : vector<12x256xi32>
    %9 = vector.broadcast %7 : vector<1x256xi32> to vector<12x256xi32>
    %10 = arith.cmpi eq, %8, %9 : vector<12x256xi32>
    %11 = arith.extui %10 : vector<12x256xi1> to vector<12x256xi32>
    %12 = arith.sitofp %11 : vector<12x256xi32> to vector<12x256xf32>
    %c0_i32_4 = arith.constant 0 : i32
    %13 = arith.cmpi ne, %arg2, %c0_i32_4 : i32
    %14 = arith.extui %13 : i1 to i32
    %c0_i32_5 = arith.constant 0 : i32
    %15 = arith.cmpi ne, %14, %c0_i32_5 : i32
    scf.if %15 {
      %c0_8 = arith.constant 0 : index
      %c0_9 = arith.constant 0 : index
      %19 = vector.load %arg5[%c0_8, %c0_9] : memref<12x32xf32, #tpu.memory_space<vmem>>, vector<12x32xf32>
      %cst = arith.constant dense<0.000000e+00> : vector<12x32xf32>
      %20 = tpu.matmul %12, %3, %cst {dimension_numbers = #tpu.dot_dimension_numbers<[1], [0], [0], [1], [0, 0, 1, 1], [], []>} : vector<12x256xf32>, vector<256x32xf32>, vector<12x32xf32> -> vector<12x32xf32>
      %21 = arith.addf %19, %20 : vector<12x32xf32>
      %c0_10 = arith.constant 0 : index
      %c0_11 = arith.constant 0 : index
      %22 = vector.load %arg5[%c0_10, %c0_11] : memref<12x32xf32, #tpu.memory_space<vmem>>, vector<12x32xf32>
      tpu.vector_store %arg5[%c0_10, %c0_11], %21 {strides = array<i32>} : memref<12x32xf32, #tpu.memory_space<vmem>>, vector<12x32xf32>,
    } else {
    }
    %c0_i32_6 = arith.constant 0 : i32
    %16 = arith.cmpi eq, %arg2, %c0_i32_6 : i32
    %17 = arith.extui %16 : i1 to i32
    %c0_i32_7 = arith.constant 0 : i32
    %18 = arith.cmpi ne, %17, %c0_i32_7 : i32
    scf.if %18 {
      %19 = tpu.iota {dimensions = array<i32: 0>} : vector<256x32xi32>
      %c200_i32 = arith.constant 200 : i32
      %20 = vector.broadcast %c200_i32 : i32 to vector<256x32xi32>
      %21 = arith.cmpi slt, %19, %20 : vector<256x32xi32>
      %cst = arith.constant 0.000000e+00 : f32
      %22 = vector.broadcast %cst : f32 to vector<256x32xf32>
      %23 = arith.select %21, %3, %22 : vector<256x32xi1>, vector<256x32xf32>
      %c0_8 = arith.constant 0 : index
      %c0_9 = arith.constant 0 : index
      %24 = vector.load %arg5[%c0_8, %c0_9] : memref<12x32xf32, #tpu.memory_space<vmem>>, vector<12x32xf32>
      %cst_10 = arith.constant dense<0.000000e+00> : vector<12x32xf32>
      %25 = tpu.matmul %12, %23, %cst_10 {dimension_numbers = #tpu.dot_dimension_numbers<[1], [0], [0], [1], [0, 0, 1, 1], [], []>} : vector<12x256xf32>, vector<256x32xf32>, vector<12x32xf32> -> vector<12x32xf32>
      %26 = arith.addf %24, %25 : vector<12x32xf32>
      %c0_11 = arith.constant 0 : index
      %c0_12 = arith.constant 0 : index
      %27 = vector.load %arg5[%c0_11, %c0_12] : memref<12x32xf32, #tpu.memory_space<vmem>>, vector<12x32xf32>
      tpu.vector_store %arg5[%c0_11, %c0_12], %26 {strides = array<i32>} : memref<12x32xf32, #tpu.memory_space<vmem>>, vector<12x32xf32>,
    } else {
    }
    return
  }
  func.func @transform_0(%arg0: i32, %arg1: i32, %arg2: i32) -> (i32, i32) {
    %c0_i32 = arith.constant 0 : i32
    %c0_i32_0 = arith.constant 0 : i32
    return %c0_i32, %arg2 : i32, i32
  }
  func.func @transform_1(%arg0: i32, %arg1: i32, %arg2: i32) -> (i32, i32) {
    %c0_i32 = arith.constant 0 : i32
    return %arg2, %arg1 : i32, i32
  }
  func.func @transform_2(%arg0: i32, %arg1: i32, %arg2: i32) -> (i32, i32) {
    %c0_i32 = arith.constant 0 : i32
    return %arg0, %arg1 : i32, i32
  }
}

</mosaic_0001>

<bundles_post_ra>
// kernel: site_embedding_gene_pooler.1
= control target key start
LH: loop header
LB: loop body
LE: loop exit
PB: predicated region body
PF: predicated region fallthrough
CT: control target
= control target key end

     0   :  { %vm16_vm0 = vcmask 261120   ;;  %v56_v3 = vlaneseq  ;;  %v466_v4 = vmov 0.0|0.0   ;;  %v467_v7 = vmov 0.0   ;;  %s628_s0 = inlined_call_operand.vmem [shape: s32[1,256], index: 0, kind: input, shape index: {}]   ;;  %s629_s1 = inlined_call_operand.vmem [shape: f32[200,32], index: 1, kind: input, shape index: {}]   ;;  %s630_s2 = inlined_call_operand.hbm [shape: f32[12,32], index: 2, kind: output, shape index: {}]  }
   0x1   :  { %v20_v0 = vld [vmem:[%s629_s1] sm:$0xff]  ;;  %v21_v1 = vld [vmem:[%s629_s1 + $0x8] sm:$0xff]  ;;  %v22_v2 = vld [vmem:[%s629_s1 + $0x10] sm:$0xff]  ;;  %374 = vmatprep.subr.bf16.mxu0 %v466_v4  ;;  %410 = vmatprep.subr.bf16.mxu1 %v466_v4  ;;  %17 = vst.msk [vmem:[#allocation2] sm:$0xff] %vm16_vm0, %v467_v7  ;;  %vm18_vm1 = vcmask 257024  }
   0x2   :  { %v375_v5 = vpack.c.bf16 %v21_v1, %v20_v0  ;;  %v23_v6 = vld [vmem:[%s629_s1 + $0x18] sm:$0xff]  ;;  %19 = vst.msk [vmem:[#allocation2 + $0x8] sm:$0xf] %vm18_vm1, %v467_v7  ;;  %v505_v8 = vshrl.u32 %v56_v3, 7  ;;  %v24_v10 = vld [vmem:[%s629_s1 + $0x20] sm:$0xff]  ;;  %v25_v11 = vld [vmem:[%s629_s1 + $0x28] sm:$0xff] }
   0x3   :  { %v378_v9 = vpack.c.bf16 %v23_v6, %v22_v2  ;;  %v381_v13 = vpack.c.bf16 %v25_v11, %v24_v10  ;;  %v26_v15 = vld [vmem:[%s629_s1 + $0x30] sm:$0xff]  ;;  %v27_v16 = vld [vmem:[%s629_s1 + $0x38] sm:$0xff]  ;;  %v530_v17 = vld [vmem:[%s628_s0] sm:$0x3] }
   0x4   :  { %376 = vmatpush1.bf16.msra.mxu0 %v375_v5  ;;  %423 = vmatpush1.bf16.msra.mxu1 %v375_v5  ;;  %v65_v12 = vsub.s32 1, %v505_v8  ;;  %v517_v14 = vadd.s32 8, %v505_v8 }
   0x5   :  { %377 = vmatprep.subr.bf16.mxu0 %v466_v4  ;;  %411 = vmatprep.subr.bf16.mxu1 %v466_v4 }
   0x6   :  { %v66_v18 = vrot.slane %v530_v17, %v65_v12 }
   0x8   :  { %379 = vmatpush1.bf16.msra.mxu0 %v378_v9  ;;  %424 = vmatpush1.bf16.msra.mxu1 %v378_v9 }
   0x9   :  { %380 = vmatprep.subr.bf16.mxu0 %v466_v4  ;;  %412 = vmatprep.subr.bf16.mxu1 %v466_v4 }
   0xa   :  { %7 = vsyncpa [#allocation3], 0  ;;  %v384_v19 = vpack.c.bf16 %v27_v16, %v26_v15  ;;  %vm68_vm2 = vcmp.eq.s32.totalorder %v505_v8, %v66_v18  ;;  %vm70_vm3 = vcmp.eq.s32.totalorder %v517_v14, %v66_v18  ;;  %v28_v20 = vld [vmem:[%s629_s1 + $0x40] sm:$0xff]  ;;  %v29_v21 = vld [vmem:[%s629_s1 + $0x48] sm:$0xff]  ;;  %v468_v22 = vmov 1.0   ;;  %s469_s3 = smov [#allocation2]  }
   0xb   :  { %370 = vmatprep.mubr.msk.f32.mxu0 %vm68_vm2, %v468_v22  ;;  %372 = vmatprep.mubr.msk.f32.mxu1 %vm70_vm3, %v468_v22  ;;  %v387_v23 = vpack.c.bf16 %v29_v21, %v28_v20  ;;  %v30_v24 = vld [vmem:[%s629_s1 + $0x50] sm:$0xff]  ;;  %v31_v25 = vld [vmem:[%s629_s1 + $0x58] sm:$0xff]  ;;  %v32_v27 = vld [vmem:[%s629_s1 + $0x60] sm:$0xff]  ;;  %v61_v44 = vsub.s32 0, %v505_v8  ;;  %s351_s4 = sshll.u32 %s469_s3, 4  ;;  %s352_s4 = int_to_ptr.vmem [resolvable:$true] %s351_s4 }
   0xc   :  { %382 = vmatpush1.bf16.msra.mxu0 %v381_v13  ;;  %425 = vmatpush1.bf16.msra.mxu1 %v381_v13  ;;  %v390_v26 = vpack.c.bf16 %v31_v25, %v30_v24  ;;  %v33_v28 = vld [vmem:[%s629_s1 + $0x68] sm:$0xff]  ;;  %v34_v30 = vld [vmem:[%s629_s1 + $0x70] sm:$0xff]  ;;  %v35_v31 = vld [vmem:[%s629_s1 + $0x78] sm:$0xff]  ;;  %p447_p1 = scmp.lt.s32.totalorder %s352_s4, %s352_s4 }
   0xd   :  { %383 = vmatprep.subr.bf16.mxu0 %v466_v4  ;;  %413 = vmatprep.subr.bf16.mxu1 %v466_v4  ;;  %v393_v29 = vpack.c.bf16 %v33_v28, %v32_v27  ;;  %v396_v32 = vpack.c.bf16 %v35_v31, %v34_v30  ;;  %v36_v33 = vld [vmem:[%s629_s1 + $0x80] sm:$0xff]  ;;  %v37_v34 = vld [vmem:[%s629_s1 + $0x88] sm:$0xff]  ;;  %v38_v36 = vld [vmem:[%s629_s1 + $0x90] sm:$0xff]  ;;  %v62_v46 = vrot.slane %v530_v17, %v61_v44 }
   0xe   :  { %v399_v35 = vpack.c.bf16 %v37_v34, %v36_v33  ;;  %v39_v37 = vld [vmem:[%s629_s1 + $0x98] sm:$0xff]  ;;  %v40_v39 = vld [vmem:[%s629_s1 + $0xa0] sm:$0xff]  ;;  %v41_v40 = vld [vmem:[%s629_s1 + $0xa8] sm:$0xff] }
   0xf   :  { %v402_v38 = vpack.c.bf16 %v39_v37, %v38_v36  ;;  %v405_v41 = vpack.c.bf16 %v41_v40, %v40_v39  ;;  %v42_v42 = vld [vmem:[%s629_s1 + $0xb0] sm:$0xff]  ;;  %v43_v43 = vld [vmem:[%s629_s1 + $0xb8] sm:$0xff]  ;;  %v44_v47 = vld [vmem:[%s629_s1 + $0xc0] sm:$0xff]  ;;  %vm67_vm4 = vcmp.eq.s32.totalorder %v505_v8, %v62_v46  ;;  %vm69_vm5 = vcmp.eq.s32.totalorder %v517_v14, %v62_v46  ;;  %s442_s1 = scalar_lea.vmem %s352_s4, 256 }
  0x10   :  { %385 = vmatpush1.bf16.msra.mxu0 %v384_v19  ;;  %426 = vmatpush1.bf16.msra.mxu1 %v384_v19  ;;  %v408_v45 = vpack.c.bf16 %v43_v43, %v42_v42  ;;  %v263_v48 = vld [vmem:[#allocation2] sm:$0xff]  ;;  %v264_v49 = vld [vmem:[#allocation2 + $0x8] sm:$0xf]  ;;  %p443_p0 = scmp.ne.s32.totalorder %s352_s4, %s442_s1  ;;  %p448_p2 = scmp.lt.s32.totalorder %s442_s1, %s442_s1 }
  0x11   :  { %386 = vmatprep.subr.bf16.mxu0 %v466_v4  ;;  %414 = vmatprep.subr.bf16.mxu1 %v466_v4 }
  0x12   :  { %p449_p3 = por %p448_p2, %p447_p1 }
  0x14   :  { %388 = vmatpush1.bf16.msra.mxu0 %v387_v23  ;;  %427 = vmatpush1.bf16.msra.mxu1 %v387_v23  ;;  %p450_p4 = pnand %p449_p3, %p443_p0 }
  0x15   :  { %389 = vmatprep.subr.bf16.mxu0 %v466_v4  ;;  %415 = vmatprep.subr.bf16.mxu1 %v466_v4 }
  0x18   :  { %391 = vmatpush1.bf16.msra.mxu0 %v390_v26  ;;  %428 = vmatpush1.bf16.msra.mxu1 %v390_v26 }
  0x19   :  { %392 = vmatprep.subr.bf16.mxu0 %v466_v4  ;;  %416 = vmatprep.subr.bf16.mxu1 %v466_v4 }
  0x1c   :  { %394 = vmatpush1.bf16.msra.mxu0 %v393_v29  ;;  %429 = vmatpush1.bf16.msra.mxu1 %v393_v29 }
  0x1d   :  { %395 = vmatprep.subr.bf16.mxu0 %v466_v4  ;;  %417 = vmatprep.subr.bf16.mxu1 %v466_v4 }
  0x20   :  { %397 = vmatpush1.bf16.msra.mxu0 %v396_v32  ;;  %430 = vmatpush1.bf16.msra.mxu1 %v396_v32 }
  0x21   :  { %398 = vmatprep.subr.bf16.mxu0 %v466_v4  ;;  %418 = vmatprep.subr.bf16.mxu1 %v466_v4 }
  0x24   :  { %400 = vmatpush1.bf16.msra.mxu0 %v399_v35  ;;  %431 = vmatpush1.bf16.msra.mxu1 %v399_v35 }
  0x25   :  { %401 = vmatprep.subr.bf16.mxu0 %v466_v4  ;;  %419 = vmatprep.subr.bf16.mxu1 %v466_v4 }
  0x28   :  { %403 = vmatpush1.bf16.msra.mxu0 %v402_v38  ;;  %432 = vmatpush1.bf16.msra.mxu1 %v402_v38 }
  0x29   :  { %404 = vmatprep.subr.bf16.mxu0 %v466_v4  ;;  %420 = vmatprep.subr.bf16.mxu1 %v466_v4 }
  0x2c   :  { %406 = vmatpush1.bf16.msra.mxu0 %v405_v41  ;;  %433 = vmatpush1.bf16.msra.mxu1 %v405_v41 }
  0x2d   :  { %407 = vmatprep.subr.bf16.mxu0 %v466_v4  ;;  %421 = vmatprep.subr.bf16.mxu1 %v466_v4 }
  0x30   :  { %409 = vmatpush1.bf16.msra.mxu0 %v408_v45  ;;  %434 = vmatpush1.bf16.msra.mxu1 %v408_v45 }
  0x31   :  { %313 = vmatprep.subr.mxu0 %v467_v7  ;;  %422 = vmatprep.subr.mxu1 %v467_v7 }
  0x34   :  { %314 = vmatpush1.msra.mxu0 %v44_v47  ;;  %435 = vmatpush1.msra.mxu1 %v44_v47 }
  0x35   :  { %371 = vmatmul.mubr.msk.f32.vlgmr.msra.gmra.mrb[0].mxu0 %vm67_vm4, %v468_v22  ;;  %373 = vmatmul.mubr.msk.f32.vlgmr.msra.gmra.mrb[0].mxu1 %vm69_vm5, %v468_v22 }
 0x108   :  { %v331_v50 = vpop.f32.mrb[0].mxu0  ;;  %v336_v51 = vpop.f32.mrb[0].mxu1 }
 0x109   :  { %v340_v52 = vadd.f32 %v331_v50, %v263_v48  ;;  %v341_v53 = vadd.f32 %v336_v51, %v264_v49  ;;  %v333_v54 = vpop.f32.mrb[1].mxu0  ;;  %v338_v55 = vpop.f32.mrb[1].mxu1 }
 0x10b   :  { %343 = vst.msk [vmem:[#allocation2] sm:$0xff] %vm16_vm0, %v340_v52 }
 0x10c   :  { %345 = vst.msk [vmem:[#allocation2 + $0x8] sm:$0xf] %vm18_vm1, %v341_v53 }
 0x10d   :  { %453 = shalt.err (!%p450_p4)
}
 0x10e   :  { %s454_s7 = scalar_lea.hbm %s630_s2, 256 }
 0x10f   :  { %p455_p5 = scmp.ne.s32.totalorder %s630_s2, %s454_s7  ;;  %p458_p6 = scmp.lt.u32.totalorder %s454_s7, %s630_s2 }
 0x111   :  { %p460_p7 = pnand %p458_p6, %p455_p5 }
 0x113   :  { %463 = shalt.err (!%p460_p7)
}
 0x114   :  { %s470_s12 = smov 128   ;;  %s471_s13 = smov 8  }
 0x115   :  { %357 = dma.vmem_to_hbm [thread:$0]  %s352_s4, 256, %s630_s2, [#allocation3], %s470_s12, %s470_s12, %s471_s13  }
 0x116   :  { %464 = dma.done.wait [#allocation3], 256  }
 0x117   :  { %465 = vsyncadd [#allocation3], 4294967040 }
 0x118   :  { %361 = vsyncpa [#allocation3], 1 }

</bundles_post_ra>
